<compile_context>
chip_gen: v6e
topology: v6e:2x2x1
jax: 0.10.0
libtpu: 0.0.40
codegen_flags: <defaults>
</compile_context>

<pallas_src>
import functools

import numpy as np

import jax
import jax.numpy as jnp
from jax import lax
from jax.experimental import pallas as pl
from jax.experimental.pallas import tpu as pltpu


def _attn_kernel(xf_ref, xt_ref, wqkv_ref, wout_ref, cq_ref, sq_ref, ck_ref, sk_ref,
                 o_ref, k_scr, v_scr, q_scr, attn_scr,
                 *, n_heads, d_head, q_tile, seq_len):
    D = n_heads * d_head
    hd2 = d_head // 2
    qi = pl.program_id(1)
    cdt = o_ref.dtype                      # MXU operand dtype follows the caller's dtype

    def rope_into(dst, col0, t, c, s):
        # t: (rows, d_head) in per-head [even | odd] order; c, s: (rows, d_head//2).
        # out[:, :hd2] = even_out, out[:, hd2:] = odd_out (same deinterleaved order for
        # q and k, so the q.k dot product is unchanged).
        te = t[:, :hd2]
        to = t[:, hd2:]
        dst[:, col0:col0 + hd2] = (te * c - to * s).astype(dst.dtype)
        dst[:, col0 + hd2:col0 + d_head] = (to * c + te * s).astype(dst.dtype)

    # ---- once per batch element: project K/V for the full sequence, rope K, park in VMEM.
    @pl.when(qi == 0)
    def _():
        xf = xf_ref[0]                                                       # (S, D)
        kv = jnp.dot(xf, wqkv_ref[:, D:],
                     preferred_element_type=jnp.float32)                     # (S, 2D)
        ck = ck_ref[...]
        sk = sk_ref[...]
        for h in range(n_heads):
            b0 = h * d_head
            rope_into(k_scr, b0, kv[:, b0:b0 + d_head], ck, sk)
        v_scr[...] = kv[:, D:].astype(v_scr.dtype)

    # ---- every step: project + rope this query tile, attend against resident K/V.
    xt = xt_ref[0]                                                           # (TQ, D)
    q_lin = jnp.dot(xt, wqkv_ref[:, :D],
                    preferred_element_type=jnp.float32)                      # (TQ, D)
    cq = cq_ref[...]
    sq = sq_ref[...]

    # Reference mask: attn_mask = ~tril -> bool mask -> True means "may attend"
    # (strictly-future keys only; the last query row is fully masked -> NaN, as in the
    # reference's math path).
    row = lax.broadcasted_iota(jnp.int32, (q_tile, seq_len), 0) + qi * q_tile
    col = lax.broadcasted_iota(jnp.int32, (q_tile, seq_len), 1)
    keep = col > row

    dn = (((1,), (1,)), ((), ()))          # contract last dims: q @ k^T without transpose
    for h in range(n_heads):
        b0 = h * d_head
        rope_into(q_scr, b0, q_lin[:, b0:b0 + d_head], cq, sq)
        qh = q_scr[:, b0:b0 + d_head]                                        # (TQ, dh)
        kh = k_scr[:, b0:b0 + d_head]                                        # (S, dh)
        vh = v_scr[:, b0:b0 + d_head]                                        # (S, dh)
        s = lax.dot_general(qh, kh, dn, preferred_element_type=jnp.float32)  # (TQ, S)
        s = jnp.where(keep, s, -jnp.inf)
        m = jnp.max(s, axis=-1, keepdims=True)
        p = jnp.exp(s - m)
        denom = jnp.sum(p, axis=-1, keepdims=True)
        o_h = jnp.dot(p.astype(cdt), vh, preferred_element_type=jnp.float32)  # (TQ, dh)
        attn_scr[:, b0:b0 + d_head] = (
            o_h * pl.reciprocal(denom, approx=True)).astype(attn_scr.dtype)

    # Single output projection over the concatenated heads (scale already in Q weights).
    o_ref[0] = jnp.dot(attn_scr[...], wout_ref[...],
                       preferred_element_type=jnp.float32).astype(o_ref.dtype)


def _pick_q_tile(seq_len):
    for t in (512, 256, 128):
        if seq_len % t == 0:
            return t
    return seq_len          # short / ragged sequences: a single tile


def _rope_tables(seq_len, d_head, theta=10000.0):
    # rotary-embedding-torch defaults: freqs = theta ** -(arange(0, d, 2)/d), pos=0..S-1.
    inv_freq = 1.0 / (theta ** (np.arange(0, d_head, 2, dtype=np.float64) / d_head))
    ang = np.arange(seq_len, dtype=np.float64)[:, None] * inv_freq[None, :]  # (S, d/2)
    # Tables stay float32 regardless of the activation dtype.
    return jnp.asarray(np.cos(ang), jnp.float32), jnp.asarray(np.sin(ang), jnp.float32)


def _qkv_permutation(dim, n_heads):
    """Output-feature permutation: [Q(deinterleaved) | K(deinterleaved) | V], head-major.

    The reference qkv layout is (head, {q,k,v}, d_head) with interleaved RoPE pairs.
    Each head's q/k features are reordered to [x0, x2, ..., x1, x3, ...] so rotate_half
    becomes two contiguous half-slices in the kernel; v keeps its original order so the
    concatenated attention output feeds out_proj unchanged.
    """
    d_head = dim // n_heads
    deint = np.concatenate([np.arange(0, d_head, 2), np.arange(1, d_head, 2)])
    pieces = []
    for which in (0, 1):                       # Q slab, K slab (deinterleaved)
        for h in range(n_heads):
            pieces.append(h * 3 * d_head + which * d_head + deint)
    for h in range(n_heads):                   # V slab, original order
        pieces.append(h * 3 * d_head + 2 * d_head + np.arange(d_head))
    return np.concatenate(pieces)


@functools.partial(jax.jit, static_argnames=("n_heads",))
def self_attention_with_rope(x, w_qkv, w_out, *, n_heads):
    B, S, D = x.shape
    assert D % n_heads == 0
    d_head = D // n_heads
    assert d_head % 2 == 0, "RoPE needs an even head dim"
    hd2 = d_head // 2

    # Host-side weight prep: permute qkv output features and fold the 1/sqrt(d_head)
    # softmax scale into the Q columns (both exact: projection and RoPE are linear).
    perm = _qkv_permutation(D, n_heads)
    w_perm = w_qkv[perm, :]
    w_perm = w_perm.at[:D, :].multiply(1.0 / (d_head ** 0.5))
    wqkv_t = w_perm.T.astype(x.dtype)                       # (D, 3D): [Q*scale | K | V]
    wout_t = w_out.T.astype(x.dtype)                        # (D, D)
    cos_t, sin_t = _rope_tables(S, d_head)                  # (S, d_head//2), float32

    TQ = _pick_q_tile(S)
    n_qt = S // TQ

    # Scoped-VMEM budget derived from the chosen tiles (headroom, capped at 64 MiB so it
    # is valid on v7x as well as v5e/v6e).
    isz = jnp.dtype(x.dtype).itemsize
    est = (2 * (3 * D * D + D * D) * isz                    # weights (double-buffered)
           + 2 * (S * D + 2 * TQ * D) * isz                 # x full + x tile + out tile
           + 4 * (S + TQ) * hd2 * 4                         # rope tables
           + (2 * S + 2 * TQ) * D * isz                     # K/V/q/attn scratch
           + 4 * TQ * (S + 3 * D) * 4)                      # in-kernel f32 temporaries
    vmem_limit = int(min(64 * 1024 * 1024, max(32 * 1024 * 1024, 2 * est)))

    kernel = functools.partial(_attn_kernel, n_heads=n_heads, d_head=d_head,
                               q_tile=TQ, seq_len=S)
    return pl.pallas_call(
        kernel,
        out_shape=jax.ShapeDtypeStruct((B, S, D), x.dtype),
        grid=(B, n_qt),
        in_specs=[
            pl.BlockSpec((1, S, D), lambda b, q: (b, 0, 0)),    # x, full sequence (K/V)
            pl.BlockSpec((1, TQ, D), lambda b, q: (b, q, 0)),   # x, this query tile
            pl.BlockSpec((D, 3 * D), lambda b, q: (0, 0)),      # W_qkv^T (permuted)
            pl.BlockSpec((D, D), lambda b, q: (0, 0)),          # W_out^T
            pl.BlockSpec((TQ, hd2), lambda b, q: (q, 0)),       # cos rows for this q tile
            pl.BlockSpec((TQ, hd2), lambda b, q: (q, 0)),       # sin rows for this q tile
            pl.BlockSpec((S, hd2), lambda b, q: (0, 0)),        # cos, full sequence (K)
            pl.BlockSpec((S, hd2), lambda b, q: (0, 0)),        # sin, full sequence (K)
        ],
        out_specs=pl.BlockSpec((1, TQ, D), lambda b, q: (b, q, 0)),
        scratch_shapes=[
            pltpu.VMEM((S, D), x.dtype),    # rotated K (all heads), resident per batch
            pltpu.VMEM((S, D), x.dtype),    # V (all heads), resident per batch
            pltpu.VMEM((TQ, D), x.dtype),   # rotated Q tile (all heads)
            pltpu.VMEM((TQ, D), x.dtype),   # concatenated attention output tile
        ],
        compiler_params=pltpu.CompilerParams(
            dimension_semantics=("parallel", "arbitrary"),
            vmem_limit_bytes=vmem_limit),
    )(x, x, wqkv_t, wout_t, cos_t, sin_t, cos_t, sin_t)


def _reference(x, w_qkv, w_out, *, n_heads):
    """Pure-JAX re-implementation of the PyTorch module (SDPA math path)."""
    B, S, D = x.shape
    dh = D // n_heads
    qkv = jnp.einsum('bsd,ed->bse', x, w_qkv).reshape(B, S, n_heads, 3, dh)
    qkv = qkv.transpose(0, 2, 1, 3, 4)                      # (B, H, S, 3, dh)
    q, k, v = qkv[..., 0, :], qkv[..., 1, :], qkv[..., 2, :]
    inv_freq = 1.0 / (10000.0 ** (np.arange(0, dh, 2) / dh))
    ang = np.arange(S)[:, None] * inv_freq[None, :]
    cos = jnp.asarray(np.repeat(np.cos(ang), 2, axis=-1), jnp.float32)
    sin = jnp.asarray(np.repeat(np.sin(ang), 2, axis=-1), jnp.float32)

    def rot_half(t):
        t2 = t.reshape(*t.shape[:-1], dh // 2, 2)
        t2 = jnp.stack([-t2[..., 1], t2[..., 0]], axis=-1)
        return t2.reshape(t.shape)

    q = q * cos + rot_half(q) * sin
    k = k * cos + rot_half(k) * sin
    s = jnp.einsum('bhqd,bhkd->bhqk', q, k) / (dh ** 0.5)
    keep = np.arange(S)[None, :] > np.arange(S)[:, None]    # ~tril, True == attend
    s = jnp.where(keep, s, -jnp.inf)
    p = jax.nn.softmax(s, axis=-1)
    o = jnp.einsum('bhqk,bhkd->bhqd', p, v)
    o = o.transpose(0, 2, 1, 3).reshape(B, S, D)
    return o @ w_out.T


if __name__ == "__main__":
    B, S, D, H = 2, 8, 32, 4          # dim=32, n_heads=4, d_head=8, dropout=0.0
    key = jax.random.PRNGKey(0)
    kx, kq, ko = jax.random.split(key, 3)
    x = jax.random.normal(kx, (B, S, D), jnp.float32)
    # nn.Linear weights: (out_features, in_features), bias=False
    w_qkv = jax.random.normal(kq, (3 * D, D), jnp.float32) * 0.02
    w_out = jax.random.normal(ko, (D, D), jnp.float32) * 0.02

    out = self_attention_with_rope(x, w_qkv, w_out, n_heads=H)
    jax.block_until_ready(out)
    assert out.shape == (B, S, D)

    ref = _reference(x, w_qkv, w_out, n_heads=H)
    # The reference's ~tril bool mask fully masks the last query row (NaN on the math
    # path); compare the finite rows and check the NaN pattern matches.
    assert bool(jnp.allclose(out[:, :-1], ref[:, :-1], rtol=5e-2, atol=1e-3)), \
        "kernel output mismatch vs pure-JAX reference"
    assert bool(jnp.all(jnp.isnan(out[:, -1]))) and bool(jnp.all(jnp.isnan(ref[:, -1])))
    print("KERNEL_OK")
</pallas_src>

<mosaic_0001>
module attributes {stable_mosaic.version = 11 : i64} {
  func.func @_attn_kernel(%arg0: i32, %arg1: i32, %arg2: memref<1x8x32xf32, #tpu.memory_space<vmem>>, %arg3: memref<1x8x32xf32, #tpu.memory_space<vmem>>, %arg4: memref<32x96xf32, #tpu.memory_space<vmem>>, %arg5: memref<32x32xf32, #tpu.memory_space<vmem>>, %arg6: memref<8x4xf32, #tpu.memory_space<vmem>>, %arg7: memref<8x4xf32, #tpu.memory_space<vmem>>, %arg8: memref<8x4xf32, #tpu.memory_space<vmem>>, %arg9: memref<8x4xf32, #tpu.memory_space<vmem>>, %arg10: memref<1x8x32xf32, #tpu.memory_space<vmem>>, %arg11: memref<8x32xf32, #tpu.memory_space<vmem>>, %arg12: memref<8x32xf32, #tpu.memory_space<vmem>>, %arg13: memref<8x32xf32, #tpu.memory_space<vmem>>, %arg14: memref<8x32xf32, #tpu.memory_space<vmem>>) attributes {dimension_semantics = [#tpu.dimension_semantics<parallel>, #tpu.dimension_semantics<arbitrary>], iteration_bounds = array<i64: 2, 1>, scalar_prefetch = 0 : i64, scratch_operands = 4 : i64, tpu.core_type = #tpu.core_type<tc>, window_params = [{transform_indices = @transform_0, window_bounds = array<i64: 1, 8, 32>}, {transform_indices = @transform_1, window_bounds = array<i64: 1, 8, 32>}, {pipeline_mode = #tpu.pipeline_mode<synchronous>, transform_indices = @transform_2, window_bounds = array<i64: 32, 96>}, {pipeline_mode = #tpu.pipeline_mode<synchronous>, transform_indices = @transform_3, window_bounds = array<i64: 32, 32>}, {transform_indices = @transform_4, window_bounds = array<i64: 8, 4>}, {transform_indices = @transform_5, window_bounds = array<i64: 8, 4>}, {pipeline_mode = #tpu.pipeline_mode<synchronous>, transform_indices = @transform_6, window_bounds = array<i64: 8, 4>}, {pipeline_mode = #tpu.pipeline_mode<synchronous>, transform_indices = @transform_7, window_bounds = array<i64: 8, 4>}, {transform_indices = @transform_8, window_bounds = array<i64: 1, 8, 32>}]} {
    %c0_i32 = arith.constant 0 : i32
    %0 = arith.cmpi eq, %arg1, %c0_i32 : i32
    %1 = arith.extui %0 : i1 to i32
    %c0_i32_0 = arith.constant 0 : i32
    %2 = arith.cmpi ne, %1, %c0_i32_0 : i32
    scf.if %2 {
      %c0_78 = arith.constant 0 : index
      %c0_79 = arith.constant 0 : index
      %c0_80 = arith.constant 0 : index
      %137 = vector.load %arg2[%c0_78, %c0_79, %c0_80] : memref<1x8x32xf32, #tpu.memory_space<vmem>>, vector<1x8x32xf32>
      %138 = vector.shape_cast %137 : vector<1x8x32xf32> to vector<8x32xf32>
      %c0_81 = arith.constant 0 : index
      %c32 = arith.constant 32 : index
      %139 = vector.load %arg4[%c0_81, %c32] : memref<32x96xf32, #tpu.memory_space<vmem>>, vector<32x64xf32>
      %cst_82 = arith.constant dense<0.000000e+00> : vector<8x64xf32>
      %140 = tpu.matmul %138, %139, %cst_82 {dimension_numbers = #tpu.dot_dimension_numbers<[1], [0], [0], [1], [0, 0, 1, 1], [], []>} : vector<8x32xf32>, vector<32x64xf32>, vector<8x64xf32> -> vector<8x64xf32>
      %c0_83 = arith.constant 0 : index
      %c0_84 = arith.constant 0 : index
      %141 = vector.load %arg8[%c0_83, %c0_84] : memref<8x4xf32, #tpu.memory_space<vmem>>, vector<8x4xf32>
      %c0_85 = arith.constant 0 : index
      %c0_86 = arith.constant 0 : index
      %142 = vector.load %arg9[%c0_85, %c0_86] : memref<8x4xf32, #tpu.memory_space<vmem>>, vector<8x4xf32>
      %143 = vector.extract_strided_slice %140 {offsets = [0, 0], sizes = [8, 8], strides = [1, 1]} : vector<8x64xf32> to vector<8x8xf32>
      %144 = vector.extract_strided_slice %143 {offsets = [0, 0], sizes = [8, 4], strides = [1, 1]} : vector<8x8xf32> to vector<8x4xf32>
      %145 = vector.extract_strided_slice %143 {offsets = [0, 4], sizes = [8, 4], strides = [1, 1]} : vector<8x8xf32> to vector<8x4xf32>
      %146 = arith.mulf %144, %141 : vector<8x4xf32>
      %147 = arith.mulf %145, %142 : vector<8x4xf32>
      %148 = arith.subf %146, %147 : vector<8x4xf32>
      %c0_87 = arith.constant 0 : index
      %c0_88 = arith.constant 0 : index
      %149 = vector.load %arg11[%c0_87, %c0_88] : memref<8x32xf32, #tpu.memory_space<vmem>>, vector<8x4xf32>
      tpu.vector_store %arg11[%c0_87, %c0_88], %148 {strides = array<i32>} : memref<8x32xf32, #tpu.memory_space<vmem>>, vector<8x4xf32>,
      %150 = arith.mulf %145, %141 : vector<8x4xf32>
      %151 = arith.mulf %144, %142 : vector<8x4xf32>
      %152 = arith.addf %150, %151 : vector<8x4xf32>
      %c0_89 = arith.constant 0 : index
      %c4_90 = arith.constant 4 : index
      %153 = vector.load %arg11[%c0_89, %c4_90] : memref<8x32xf32, #tpu.memory_space<vmem>>, vector<8x4xf32>
      tpu.vector_store %arg11[%c0_89, %c4_90], %152 {strides = array<i32>} : memref<8x32xf32, #tpu.memory_space<vmem>>, vector<8x4xf32>,
      %154 = vector.extract_strided_slice %140 {offsets = [0, 8], sizes = [8, 8], strides = [1, 1]} : vector<8x64xf32> to vector<8x8xf32>
      %155 = vector.extract_strided_slice %154 {offsets = [0, 0], sizes = [8, 4], strides = [1, 1]} : vector<8x8xf32> to vector<8x4xf32>
      %156 = vector.extract_strided_slice %154 {offsets = [0, 4], sizes = [8, 4], strides = [1, 1]} : vector<8x8xf32> to vector<8x4xf32>
      %157 = arith.mulf %155, %141 : vector<8x4xf32>
      %158 = arith.mulf %156, %142 : vector<8x4xf32>
      %159 = arith.subf %157, %158 : vector<8x4xf32>
      %c0_91 = arith.constant 0 : index
      %c8_92 = arith.constant 8 : index
      %160 = vector.load %arg11[%c0_91, %c8_92] : memref<8x32xf32, #tpu.memory_space<vmem>>, vector<8x4xf32>
      tpu.vector_store %arg11[%c0_91, %c8_92], %159 {strides = array<i32>} : memref<8x32xf32, #tpu.memory_space<vmem>>, vector<8x4xf32>,
      %161 = arith.mulf %156, %141 : vector<8x4xf32>
      %162 = arith.mulf %155, %142 : vector<8x4xf32>
      %163 = arith.addf %161, %162 : vector<8x4xf32>
      %c0_93 = arith.constant 0 : index
      %c12_94 = arith.constant 12 : index
      %164 = vector.load %arg11[%c0_93, %c12_94] : memref<8x32xf32, #tpu.memory_space<vmem>>, vector<8x4xf32>
      tpu.vector_store %arg11[%c0_93, %c12_94], %163 {strides = array<i32>} : memref<8x32xf32, #tpu.memory_space<vmem>>, vector<8x4xf32>,
      %165 = vector.extract_strided_slice %140 {offsets = [0, 16], sizes = [8, 8], strides = [1, 1]} : vector<8x64xf32> to vector<8x8xf32>
      %166 = vector.extract_strided_slice %165 {offsets = [0, 0], sizes = [8, 4], strides = [1, 1]} : vector<8x8xf32> to vector<8x4xf32>
      %167 = vector.extract_strided_slice %165 {offsets = [0, 4], sizes = [8, 4], strides = [1, 1]} : vector<8x8xf32> to vector<8x4xf32>
      %168 = arith.mulf %166, %141 : vector<8x4xf32>
      %169 = arith.mulf %167, %142 : vector<8x4xf32>
      %170 = arith.subf %168, %169 : vector<8x4xf32>
      %c0_95 = arith.constant 0 : index
      %c16_96 = arith.constant 16 : index
      %171 = vector.load %arg11[%c0_95, %c16_96] : memref<8x32xf32, #tpu.memory_space<vmem>>, vector<8x4xf32>
      tpu.vector_store %arg11[%c0_95, %c16_96], %170 {strides = array<i32>} : memref<8x32xf32, #tpu.memory_space<vmem>>, vector<8x4xf32>,
      %172 = arith.mulf %167, %141 : vector<8x4xf32>
      %173 = arith.mulf %166, %142 : vector<8x4xf32>
      %174 = arith.addf %172, %173 : vector<8x4xf32>
      %c0_97 = arith.constant 0 : index
      %c20_98 = arith.constant 20 : index
      %175 = vector.load %arg11[%c0_97, %c20_98] : memref<8x32xf32, #tpu.memory_space<vmem>>, vector<8x4xf32>
      tpu.vector_store %arg11[%c0_97, %c20_98], %174 {strides = array<i32>} : memref<8x32xf32, #tpu.memory_space<vmem>>, vector<8x4xf32>,
      %176 = vector.extract_strided_slice %140 {offsets = [0, 24], sizes = [8, 8], strides = [1, 1]} : vector<8x64xf32> to vector<8x8xf32>
      %177 = vector.extract_strided_slice %176 {offsets = [0, 0], sizes = [8, 4], strides = [1, 1]} : vector<8x8xf32> to vector<8x4xf32>
      %178 = vector.extract_strided_slice %176 {offsets = [0, 4], sizes = [8, 4], strides = [1, 1]} : vector<8x8xf32> to vector<8x4xf32>
      %179 = arith.mulf %177, %141 : vector<8x4xf32>
      %180 = arith.mulf %178, %142 : vector<8x4xf32>
      %181 = arith.subf %179, %180 : vector<8x4xf32>
      %c0_99 = arith.constant 0 : index
      %c24_100 = arith.constant 24 : index
      %182 = vector.load %arg11[%c0_99, %c24_100] : memref<8x32xf32, #tpu.memory_space<vmem>>, vector<8x4xf32>
      tpu.vector_store %arg11[%c0_99, %c24_100], %181 {strides = array<i32>} : memref<8x32xf32, #tpu.memory_space<vmem>>, vector<8x4xf32>,
      %183 = arith.mulf %178, %141 : vector<8x4xf32>
      %184 = arith.mulf %177, %142 : vector<8x4xf32>
      %185 = arith.addf %183, %184 : vector<8x4xf32>
      %c0_101 = arith.constant 0 : index
      %c28_102 = arith.constant 28 : index
      %186 = vector.load %arg11[%c0_101, %c28_102] : memref<8x32xf32, #tpu.memory_space<vmem>>, vector<8x4xf32>
      tpu.vector_store %arg11[%c0_101, %c28_102], %185 {strides = array<i32>} : memref<8x32xf32, #tpu.memory_space<vmem>>, vector<8x4xf32>,
      %187 = vector.extract_strided_slice %140 {offsets = [0, 32], sizes = [8, 32], strides = [1, 1]} : vector<8x64xf32> to vector<8x32xf32>
      %c0_103 = arith.constant 0 : index
      %c0_104 = arith.constant 0 : index
      %188 = vector.load %arg12[%c0_103, %c0_104] : memref<8x32xf32, #tpu.memory_space<vmem>>, vector<8x32xf32>
      tpu.vector_store %arg12[%c0_103, %c0_104], %187 {strides = array<i32>} : memref<8x32xf32, #tpu.memory_space<vmem>>, vector<8x32xf32>,
    } else {
    }
    %c0 = arith.constant 0 : index
    %c0_1 = arith.constant 0 : index
    %c0_2 = arith.constant 0 : index
    %3 = vector.load %arg3[%c0, %c0_1, %c0_2] : memref<1x8x32xf32, #tpu.memory_space<vmem>>, vector<1x8x32xf32>
    %4 = vector.shape_cast %3 : vector<1x8x32xf32> to vector<8x32xf32>
    %c0_3 = arith.constant 0 : index
    %c0_4 = arith.constant 0 : index
    %5 = vector.load %arg4[%c0_3, %c0_4] : memref<32x96xf32, #tpu.memory_space<vmem>>, vector<32x32xf32>
    %cst = arith.constant dense<0.000000e+00> : vector<8x32xf32>
    %6 = tpu.matmul %4, %5, %cst {dimension_numbers = #tpu.dot_dimension_numbers<[1], [0], [0], [1], [0, 0, 1, 1], [], []>} : vector<8x32xf32>, vector<32x32xf32>, vector<8x32xf32> -> vector<8x32xf32>
    %c0_5 = arith.constant 0 : index
    %c0_6 = arith.constant 0 : index
    %7 = vector.load %arg6[%c0_5, %c0_6] : memref<8x4xf32, #tpu.memory_space<vmem>>, vector<8x4xf32>
    %c0_7 = arith.constant 0 : index
    %c0_8 = arith.constant 0 : index
    %8 = vector.load %arg7[%c0_7, %c0_8] : memref<8x4xf32, #tpu.memory_space<vmem>>, vector<8x4xf32>
    %9 = tpu.iota {dimensions = array<i32: 0>} : vector<8x8xi32>
    %c8_i32 = arith.constant 8 : i32
    %10 = arith.muli %arg1, %c8_i32 : i32
    %11 = vector.broadcast %10 : i32 to vector<8x8xi32>
    %12 = arith.addi %9, %11 : vector<8x8xi32>
    %13 = tpu.iota {dimensions = array<i32: 1>} : vector<8x8xi32>
    %14 = arith.cmpi sgt, %13, %12 : vector<8x8xi32>
    %15 = vector.extract_strided_slice %6 {offsets = [0, 0], sizes = [8, 8], strides = [1, 1]} : vector<8x32xf32> to vector<8x8xf32>
    %16 = vector.extract_strided_slice %15 {offsets = [0, 0], sizes = [8, 4], strides = [1, 1]} : vector<8x8xf32> to vector<8x4xf32>
    %17 = vector.extract_strided_slice %15 {offsets = [0, 4], sizes = [8, 4], strides = [1, 1]} : vector<8x8xf32> to vector<8x4xf32>
    %18 = arith.mulf %16, %7 : vector<8x4xf32>
    %19 = arith.mulf %17, %8 : vector<8x4xf32>
    %20 = arith.subf %18, %19 : vector<8x4xf32>
    %c0_9 = arith.constant 0 : index
    %c0_10 = arith.constant 0 : index
    %21 = vector.load %arg13[%c0_9, %c0_10] : memref<8x32xf32, #tpu.memory_space<vmem>>, vector<8x4xf32>
    tpu.vector_store %arg13[%c0_9, %c0_10], %20 {strides = array<i32>} : memref<8x32xf32, #tpu.memory_space<vmem>>, vector<8x4xf32>,
    %22 = arith.mulf %17, %7 : vector<8x4xf32>
    %23 = arith.mulf %16, %8 : vector<8x4xf32>
    %24 = arith.addf %22, %23 : vector<8x4xf32>
    %c0_11 = arith.constant 0 : index
    %c4 = arith.constant 4 : index
    %25 = vector.load %arg13[%c0_11, %c4] : memref<8x32xf32, #tpu.memory_space<vmem>>, vector<8x4xf32>
    tpu.vector_store %arg13[%c0_11, %c4], %24 {strides = array<i32>} : memref<8x32xf32, #tpu.memory_space<vmem>>, vector<8x4xf32>,
    %c0_12 = arith.constant 0 : index
    %c0_13 = arith.constant 0 : index
    %26 = vector.load %arg13[%c0_12, %c0_13] : memref<8x32xf32, #tpu.memory_space<vmem>>, vector<8x8xf32>
    %c0_14 = arith.constant 0 : index
    %c0_15 = arith.constant 0 : index
    %27 = vector.load %arg11[%c0_14, %c0_15] : memref<8x32xf32, #tpu.memory_space<vmem>>, vector<8x8xf32>
    %c0_16 = arith.constant 0 : index
    %c0_17 = arith.constant 0 : index
    %28 = vector.load %arg12[%c0_16, %c0_17] : memref<8x32xf32, #tpu.memory_space<vmem>>, vector<8x8xf32>
    %cst_18 = arith.constant dense<0.000000e+00> : vector<8x8xf32>
    %29 = tpu.matmul %26, %27, %cst_18 {dimension_numbers = #tpu.dot_dimension_numbers<[1], [1], [0], [0], [0, 0, 1, 0], [], []>} : vector<8x8xf32>, vector<8x8xf32>, vector<8x8xf32> -> vector<8x8xf32>
    %cst_19 = arith.constant 0xFF800000 : f32
    %30 = vector.broadcast %cst_19 : f32 to vector<8x8xf32>
    %31 = arith.select %14, %29, %30 : vector<8x8xi1>, vector<8x8xf32>
    %cst_20 = arith.constant dense<0xFF800000> : vector<8xf32>
    %32 = vector.multi_reduction <maximumf>, %31, %cst_20 [1] : vector<8x8xf32> to vector<8xf32>
    %33 = vector.shape_cast %32 : vector<8xf32> to vector<8x1xf32>
    %34 = vector.broadcast %33 : vector<8x1xf32> to vector<8x8xf32>
    %35 = arith.subf %31, %34 : vector<8x8xf32>
    %36 = math.exp %35 : vector<8x8xf32>
    %cst_21 = arith.constant dense<0.000000e+00> : vector<8xf32>
    %37 = vector.multi_reduction <add>, %36, %cst_21 [1] : vector<8x8xf32> to vector<8xf32>
    %38 = vector.shape_cast %37 : vector<8xf32> to vector<8x1xf32>
    %cst_22 = arith.constant dense<0.000000e+00> : vector<8x8xf32>
    %39 = tpu.matmul %36, %28, %cst_22 {dimension_numbers = #tpu.dot_dimension_numbers<[1], [0], [0], [1], [0, 0, 1, 1], [], []>} : vector<8x8xf32>, vector<8x8xf32>, vector<8x8xf32> -> vector<8x8xf32>
    %40 = tpu.reciprocal %38 {approx = true} : vector<8x1xf32> -> vector<8x1xf32>
    %41 = vector.broadcast %40 : vector<8x1xf32> to vector<8x8xf32>
    %42 = arith.mulf %39, %41 : vector<8x8xf32>
    %c0_23 = arith.constant 0 : index
    %c0_24 = arith.constant 0 : index
    %43 = vector.load %arg14[%c0_23, %c0_24] : memref<8x32xf32, #tpu.memory_space<vmem>>, vector<8x8xf32>
    tpu.vector_store %arg14[%c0_23, %c0_24], %42 {strides = array<i32>} : memref<8x32xf32, #tpu.memory_space<vmem>>, vector<8x8xf32>,
    %44 = vector.extract_strided_slice %6 {offsets = [0, 8], sizes = [8, 8], strides = [1, 1]} : vector<8x32xf32> to vector<8x8xf32>
    %45 = vector.extract_strided_slice %44 {offsets = [0, 0], sizes = [8, 4], strides = [1, 1]} : vector<8x8xf32> to vector<8x4xf32>
    %46 = vector.extract_strided_slice %44 {offsets = [0, 4], sizes = [8, 4], strides = [1, 1]} : vector<8x8xf32> to vector<8x4xf32>
    %47 = arith.mulf %45, %7 : vector<8x4xf32>
    %48 = arith.mulf %46, %8 : vector<8x4xf32>
    %49 = arith.subf %47, %48 : vector<8x4xf32>
    %c0_25 = arith.constant 0 : index
    %c8 = arith.constant 8 : index
    %50 = vector.load %arg13[%c0_25, %c8] : memref<8x32xf32, #tpu.memory_space<vmem>>, vector<8x4xf32>
    tpu.vector_store %arg13[%c0_25, %c8], %49 {strides = array<i32>} : memref<8x32xf32, #tpu.memory_space<vmem>>, vector<8x4xf32>,
    %51 = arith.mulf %46, %7 : vector<8x4xf32>
    %52 = arith.mulf %45, %8 : vector<8x4xf32>
    %53 = arith.addf %51, %52 : vector<8x4xf32>
    %c0_26 = arith.constant 0 : index
    %c12 = arith.constant 12 : index
    %54 = vector.load %arg13[%c0_26, %c12] : memref<8x32xf32, #tpu.memory_space<vmem>>, vector<8x4xf32>
    tpu.vector_store %arg13[%c0_26, %c12], %53 {strides = array<i32>} : memref<8x32xf32, #tpu.memory_space<vmem>>, vector<8x4xf32>,
    %c0_27 = arith.constant 0 : index
    %c8_28 = arith.constant 8 : index
    %55 = vector.load %arg13[%c0_27, %c8_28] : memref<8x32xf32, #tpu.memory_space<vmem>>, vector<8x8xf32>
    %c0_29 = arith.constant 0 : index
    %c8_30 = arith.constant 8 : index
    %56 = vector.load %arg11[%c0_29, %c8_30] : memref<8x32xf32, #tpu.memory_space<vmem>>, vector<8x8xf32>
    %c0_31 = arith.constant 0 : index
    %c8_32 = arith.constant 8 : index
    %57 = vector.load %arg12[%c0_31, %c8_32] : memref<8x32xf32, #tpu.memory_space<vmem>>, vector<8x8xf32>
    %cst_33 = arith.constant dense<0.000000e+00> : vector<8x8xf32>
    %58 = tpu.matmul %55, %56, %cst_33 {dimension_numbers = #tpu.dot_dimension_numbers<[1], [1], [0], [0], [0, 0, 1, 0], [], []>} : vector<8x8xf32>, vector<8x8xf32>, vector<8x8xf32> -> vector<8x8xf32>
    %cst_34 = arith.constant 0xFF800000 : f32
    %59 = vector.broadcast %cst_34 : f32 to vector<8x8xf32>
    %60 = arith.select %14, %58, %59 : vector<8x8xi1>, vector<8x8xf32>
    %cst_35 = arith.constant dense<0xFF800000> : vector<8xf32>
    %61 = vector.multi_reduction <maximumf>, %60, %cst_35 [1] : vector<8x8xf32> to vector<8xf32>
    %62 = vector.shape_cast %61 : vector<8xf32> to vector<8x1xf32>
    %63 = vector.broadcast %62 : vector<8x1xf32> to vector<8x8xf32>
    %64 = arith.subf %60, %63 : vector<8x8xf32>
    %65 = math.exp %64 : vector<8x8xf32>
    %cst_36 = arith.constant dense<0.000000e+00> : vector<8xf32>
    %66 = vector.multi_reduction <add>, %65, %cst_36 [1] : vector<8x8xf32> to vector<8xf32>
    %67 = vector.shape_cast %66 : vector<8xf32> to vector<8x1xf32>
    %cst_37 = arith.constant dense<0.000000e+00> : vector<8x8xf32>
    %68 = tpu.matmul %65, %57, %cst_37 {dimension_numbers = #tpu.dot_dimension_numbers<[1], [0], [0], [1], [0, 0, 1, 1], [], []>} : vector<8x8xf32>, vector<8x8xf32>, vector<8x8xf32> -> vector<8x8xf32>
    %69 = tpu.reciprocal %67 {approx = true} : vector<8x1xf32> -> vector<8x1xf32>
    %70 = vector.broadcast %69 : vector<8x1xf32> to vector<8x8xf32>
    %71 = arith.mulf %68, %70 : vector<8x8xf32>
    %c0_38 = arith.constant 0 : index
    %c8_39 = arith.constant 8 : index
    %72 = vector.load %arg14[%c0_38, %c8_39] : memref<8x32xf32, #tpu.memory_space<vmem>>, vector<8x8xf32>
    tpu.vector_store %arg14[%c0_38, %c8_39], %71 {strides = array<i32>} : memref<8x32xf32, #tpu.memory_space<vmem>>, vector<8x8xf32>,
    %73 = vector.extract_strided_slice %6 {offsets = [0, 16], sizes = [8, 8], strides = [1, 1]} : vector<8x32xf32> to vector<8x8xf32>
    %74 = vector.extract_strided_slice %73 {offsets = [0, 0], sizes = [8, 4], strides = [1, 1]} : vector<8x8xf32> to vector<8x4xf32>
    %75 = vector.extract_strided_slice %73 {offsets = [0, 4], sizes = [8, 4], strides = [1, 1]} : vector<8x8xf32> to vector<8x4xf32>
    %76 = arith.mulf %74, %7 : vector<8x4xf32>
    %77 = arith.mulf %75, %8 : vector<8x4xf32>
    %78 = arith.subf %76, %77 : vector<8x4xf32>
    %c0_40 = arith.constant 0 : index
    %c16 = arith.constant 16 : index
    %79 = vector.load %arg13[%c0_40, %c16] : memref<8x32xf32, #tpu.memory_space<vmem>>, vector<8x4xf32>
    tpu.vector_store %arg13[%c0_40, %c16], %78 {strides = array<i32>} : memref<8x32xf32, #tpu.memory_space<vmem>>, vector<8x4xf32>,
    %80 = arith.mulf %75, %7 : vector<8x4xf32>
    %81 = arith.mulf %74, %8 : vector<8x4xf32>
    %82 = arith.addf %80, %81 : vector<8x4xf32>
    %c0_41 = arith.constant 0 : index
    %c20 = arith.constant 20 : index
    %83 = vector.load %arg13[%c0_41, %c20] : memref<8x32xf32, #tpu.memory_space<vmem>>, vector<8x4xf32>
    tpu.vector_store %arg13[%c0_41, %c20], %82 {strides = array<i32>} : memref<8x32xf32, #tpu.memory_space<vmem>>, vector<8x4xf32>,
    %c0_42 = arith.constant 0 : index
    %c16_43 = arith.constant 16 : index
    %84 = vector.load %arg13[%c0_42, %c16_43] : memref<8x32xf32, #tpu.memory_space<vmem>>, vector<8x8xf32>
    %c0_44 = arith.constant 0 : index
    %c16_45 = arith.constant 16 : index
    %85 = vector.load %arg11[%c0_44, %c16_45] : memref<8x32xf32, #tpu.memory_space<vmem>>, vector<8x8xf32>
    %c0_46 = arith.constant 0 : index
    %c16_47 = arith.constant 16 : index
    %86 = vector.load %arg12[%c0_46, %c16_47] : memref<8x32xf32, #tpu.memory_space<vmem>>, vector<8x8xf32>
    %cst_48 = arith.constant dense<0.000000e+00> : vector<8x8xf32>
    %87 = tpu.matmul %84, %85, %cst_48 {dimension_numbers = #tpu.dot_dimension_numbers<[1], [1], [0], [0], [0, 0, 1, 0], [], []>} : vector<8x8xf32>, vector<8x8xf32>, vector<8x8xf32> -> vector<8x8xf32>
    %cst_49 = arith.constant 0xFF800000 : f32
    %88 = vector.broadcast %cst_49 : f32 to vector<8x8xf32>
    %89 = arith.select %14, %87, %88 : vector<8x8xi1>, vector<8x8xf32>
    %cst_50 = arith.constant dense<0xFF800000> : vector<8xf32>
    %90 = vector.multi_reduction <maximumf>, %89, %cst_50 [1] : vector<8x8xf32> to vector<8xf32>
    %91 = vector.shape_cast %90 : vector<8xf32> to vector<8x1xf32>
    %92 = vector.broadcast %91 : vector<8x1xf32> to vector<8x8xf32>
    %93 = arith.subf %89, %92 : vector<8x8xf32>
    %94 = math.exp %93 : vector<8x8xf32>
    %cst_51 = arith.constant dense<0.000000e+00> : vector<8xf32>
    %95 = vector.multi_reduction <add>, %94, %cst_51 [1] : vector<8x8xf32> to vector<8xf32>
    %96 = vector.shape_cast %95 : vector<8xf32> to vector<8x1xf32>
    %cst_52 = arith.constant dense<0.000000e+00> : vector<8x8xf32>
    %97 = tpu.matmul %94, %86, %cst_52 {dimension_numbers = #tpu.dot_dimension_numbers<[1], [0], [0], [1], [0, 0, 1, 1], [], []>} : vector<8x8xf32>, vector<8x8xf32>, vector<8x8xf32> -> vector<8x8xf32>
    %98 = tpu.reciprocal %96 {approx = true} : vector<8x1xf32> -> vector<8x1xf32>
    %99 = vector.broadcast %98 : vector<8x1xf32> to vector<8x8xf32>
    %100 = arith.mulf %97, %99 : vector<8x8xf32>
    %c0_53 = arith.constant 0 : index
    %c16_54 = arith.constant 16 : index
    %101 = vector.load %arg14[%c0_53, %c16_54] : memref<8x32xf32, #tpu.memory_space<vmem>>, vector<8x8xf32>
    tpu.vector_store %arg14[%c0_53, %c16_54], %100 {strides = array<i32>} : memref<8x32xf32, #tpu.memory_space<vmem>>, vector<8x8xf32>,
    %102 = vector.extract_strided_slice %6 {offsets = [0, 24], sizes = [8, 8], strides = [1, 1]} : vector<8x32xf32> to vector<8x8xf32>
    %103 = vector.extract_strided_slice %102 {offsets = [0, 0], sizes = [8, 4], strides = [1, 1]} : vector<8x8xf32> to vector<8x4xf32>
    %104 = vector.extract_strided_slice %102 {offsets = [0, 4], sizes = [8, 4], strides = [1, 1]} : vector<8x8xf32> to vector<8x4xf32>
    %105 = arith.mulf %103, %7 : vector<8x4xf32>
    %106 = arith.mulf %104, %8 : vector<8x4xf32>
    %107 = arith.subf %105, %106 : vector<8x4xf32>
    %c0_55 = arith.constant 0 : index
    %c24 = arith.constant 24 : index
    %108 = vector.load %arg13[%c0_55, %c24] : memref<8x32xf32, #tpu.memory_space<vmem>>, vector<8x4xf32>
    tpu.vector_store %arg13[%c0_55, %c24], %107 {strides = array<i32>} : memref<8x32xf32, #tpu.memory_space<vmem>>, vector<8x4xf32>,
    %109 = arith.mulf %104, %7 : vector<8x4xf32>
    %110 = arith.mulf %103, %8 : vector<8x4xf32>
    %111 = arith.addf %109, %110 : vector<8x4xf32>
    %c0_56 = arith.constant 0 : index
    %c28 = arith.constant 28 : index
    %112 = vector.load %arg13[%c0_56, %c28] : memref<8x32xf32, #tpu.memory_space<vmem>>, vector<8x4xf32>
    tpu.vector_store %arg13[%c0_56, %c28], %111 {strides = array<i32>} : memref<8x32xf32, #tpu.memory_space<vmem>>, vector<8x4xf32>,
    %c0_57 = arith.constant 0 : index
    %c24_58 = arith.constant 24 : index
    %113 = vector.load %arg13[%c0_57, %c24_58] : memref<8x32xf32, #tpu.memory_space<vmem>>, vector<8x8xf32>
    %c0_59 = arith.constant 0 : index
    %c24_60 = arith.constant 24 : index
    %114 = vector.load %arg11[%c0_59, %c24_60] : memref<8x32xf32, #tpu.memory_space<vmem>>, vector<8x8xf32>
    %c0_61 = arith.constant 0 : index
    %c24_62 = arith.constant 24 : index
    %115 = vector.load %arg12[%c0_61, %c24_62] : memref<8x32xf32, #tpu.memory_space<vmem>>, vector<8x8xf32>
    %cst_63 = arith.constant dense<0.000000e+00> : vector<8x8xf32>
    %116 = tpu.matmul %113, %114, %cst_63 {dimension_numbers = #tpu.dot_dimension_numbers<[1], [1], [0], [0], [0, 0, 1, 0], [], []>} : vector<8x8xf32>, vector<8x8xf32>, vector<8x8xf32> -> vector<8x8xf32>
    %cst_64 = arith.constant 0xFF800000 : f32
    %117 = vector.broadcast %cst_64 : f32 to vector<8x8xf32>
    %118 = arith.select %14, %116, %117 : vector<8x8xi1>, vector<8x8xf32>
    %cst_65 = arith.constant dense<0xFF800000> : vector<8xf32>
    %119 = vector.multi_reduction <maximumf>, %118, %cst_65 [1] : vector<8x8xf32> to vector<8xf32>
    %120 = vector.shape_cast %119 : vector<8xf32> to vector<8x1xf32>
    %121 = vector.broadcast %120 : vector<8x1xf32> to vector<8x8xf32>
    %122 = arith.subf %118, %121 : vector<8x8xf32>
    %123 = math.exp %122 : vector<8x8xf32>
    %cst_66 = arith.constant dense<0.000000e+00> : vector<8xf32>
    %124 = vector.multi_reduction <add>, %123, %cst_66 [1] : vector<8x8xf32> to vector<8xf32>
    %125 = vector.shape_cast %124 : vector<8xf32> to vector<8x1xf32>
    %cst_67 = arith.constant dense<0.000000e+00> : vector<8x8xf32>
    %126 = tpu.matmul %123, %115, %cst_67 {dimension_numbers = #tpu.dot_dimension_numbers<[1], [0], [0], [1], [0, 0, 1, 1], [], []>} : vector<8x8xf32>, vector<8x8xf32>, vector<8x8xf32> -> vector<8x8xf32>
    %127 = tpu.reciprocal %125 {approx = true} : vector<8x1xf32> -> vector<8x1xf32>
    %128 = vector.broadcast %127 : vector<8x1xf32> to vector<8x8xf32>
    %129 = arith.mulf %126, %128 : vector<8x8xf32>
    %c0_68 = arith.constant 0 : index
    %c24_69 = arith.constant 24 : index
    %130 = vector.load %arg14[%c0_68, %c24_69] : memref<8x32xf32, #tpu.memory_space<vmem>>, vector<8x8xf32>
    tpu.vector_store %arg14[%c0_68, %c24_69], %129 {strides = array<i32>} : memref<8x32xf32, #tpu.memory_space<vmem>>, vector<8x8xf32>,
    %c0_70 = arith.constant 0 : index
    %c0_71 = arith.constant 0 : index
    %131 = vector.load %arg14[%c0_70, %c0_71] : memref<8x32xf32, #tpu.memory_space<vmem>>, vector<8x32xf32>
    %c0_72 = arith.constant 0 : index
    %c0_73 = arith.constant 0 : index
    %132 = vector.load %arg5[%c0_72, %c0_73] : memref<32x32xf32, #tpu.memory_space<vmem>>, vector<32x32xf32>
    %cst_74 = arith.constant dense<0.000000e+00> : vector<8x32xf32>
    %133 = tpu.matmul %131, %132, %cst_74 {dimension_numbers = #tpu.dot_dimension_numbers<[1], [0], [0], [1], [0, 0, 1, 1], [], []>} : vector<8x32xf32>, vector<32x32xf32>, vector<8x32xf32> -> vector<8x32xf32>
    %c0_75 = arith.constant 0 : index
    %c0_76 = arith.constant 0 : index
    %c0_77 = arith.constant 0 : index
    %134 = vector.load %arg10[%c0_75, %c0_76, %c0_77] : memref<1x8x32xf32, #tpu.memory_space<vmem>>, vector<1x8x32xf32>
    %135 = vector.shape_cast %134 : vector<1x8x32xf32> to vector<8x32xf32>
    %136 = vector.shape_cast %133 : vector<8x32xf32> to vector<1x8x32xf32>
    tpu.vector_store %arg10[%c0_75, %c0_76, %c0_77], %136 {strides = array<i32>} : memref<1x8x32xf32, #tpu.memory_space<vmem>>, vector<1x8x32xf32>,
    return
  }
  func.func @transform_0(%arg0: i32, %arg1: i32) -> (i32, i32, i32) {
    %c0_i32 = arith.constant 0 : i32
    %c0_i32_0 = arith.constant 0 : i32
    %c0_i32_1 = arith.constant 0 : i32
    return %arg0, %c0_i32, %c0_i32_0 : i32, i32, i32
  }
  func.func @transform_1(%arg0: i32, %arg1: i32) -> (i32, i32, i32) {
    %c0_i32 = arith.constant 0 : i32
    %c0_i32_0 = arith.constant 0 : i32
    return %arg0, %arg1, %c0_i32 : i32, i32, i32
  }
  func.func @transform_2(%arg0: i32, %arg1: i32) -> (i32, i32) {
    %c0_i32 = arith.constant 0 : i32
    %c0_i32_0 = arith.constant 0 : i32
    %c0_i32_1 = arith.constant 0 : i32
    return %c0_i32, %c0_i32_0 : i32, i32
  }
  func.func @transform_3(%arg0: i32, %arg1: i32) -> (i32, i32) {
    %c0_i32 = arith.constant 0 : i32
    %c0_i32_0 = arith.constant 0 : i32
    %c0_i32_1 = arith.constant 0 : i32
    return %c0_i32, %c0_i32_0 : i32, i32
  }
  func.func @transform_4(%arg0: i32, %arg1: i32) -> (i32, i32) {
    %c0_i32 = arith.constant 0 : i32
    %c0_i32_0 = arith.constant 0 : i32
    return %arg1, %c0_i32 : i32, i32
  }
  func.func @transform_5(%arg0: i32, %arg1: i32) -> (i32, i32) {
    %c0_i32 = arith.constant 0 : i32
    %c0_i32_0 = arith.constant 0 : i32
    return %arg1, %c0_i32 : i32, i32
  }
  func.func @transform_6(%arg0: i32, %arg1: i32) -> (i32, i32) {
    %c0_i32 = arith.constant 0 : i32
    %c0_i32_0 = arith.constant 0 : i32
    %c0_i32_1 = arith.constant 0 : i32
    return %c0_i32, %c0_i32_0 : i32, i32
  }
  func.func @transform_7(%arg0: i32, %arg1: i32) -> (i32, i32) {
    %c0_i32 = arith.constant 0 : i32
    %c0_i32_0 = arith.constant 0 : i32
    %c0_i32_1 = arith.constant 0 : i32
    return %c0_i32, %c0_i32_0 : i32, i32
  }
  func.func @transform_8(%arg0: i32, %arg1: i32) -> (i32, i32, i32) {
    %c0_i32 = arith.constant 0 : i32
    %c0_i32_0 = arith.constant 0 : i32
    return %arg0, %arg1, %c0_i32 : i32, i32, i32
  }
}

</mosaic_0001>

<bundles_post_ra>
// kernel: self_attention_with_rope.1
= control target key start
LH: loop header
LB: loop body
LE: loop exit
PB: predicated region body
PF: predicated region fallthrough
CT: control target
= control target key end

     0   :  { %13 = vsyncpa [#allocation7], 0  ;;  %s2463_s0 = inlined_call_operand.vmem [shape: f32[2,8,32], index: 0, kind: input, shape index: {}, may-alias: {0,1}]   ;;  %s2464_s1 = inlined_call_operand.vmem [shape: f32[2,8,32], index: 1, kind: input, shape index: {}, may-alias: {0,1}]   ;;  %s2465_s2 = inlined_call_operand.vmem [shape: f32[32,96], index: 2, kind: input, shape index: {}]   ;;  %s2466_s3 = inlined_call_operand.vmem [shape: f32[32,32], index: 3, kind: input, shape index: {}]   ;;  %s2467_s4 = inlined_call_operand.vmem [shape: f32[8,4], index: 4, kind: input, shape index: {}, may-alias: {4,6}]   ;;  %s2468_s5 = inlined_call_operand.vmem [shape: f32[8,4], index: 5, kind: input, shape index: {}, may-alias: {5,7}]   ;;  %s2469_s6 = inlined_call_operand.vmem [shape: f32[8,4], index: 6, kind: input, shape index: {}, may-alias: {4,6}]   ;;  %s2470_s7 = inlined_call_operand.vmem [shape: f32[8,4], index: 7, kind: input, shape index: {}, may-alias: {5,7}]   ;;  %s2471_s8 = inlined_call_operand.hbm [shape: f32[2,8,32], index: 8, kind: output, shape index: {}]  }
   0x1   :  { %15 = vsyncpa [#allocation7 + $0x1], 0  ;;  %s2067_s27 = smov 0   ;;  %s2069_s28 = smov 0  }
   0x2   :  { %s2071_s29 = smov 0   ;;  %s2073_s30 = smov 0  }
   0x3   :  { %s2075_s9 = smov 0   ;;  %s2077_s10 = smov 0  }
   0x4 LB: > { %s1711_s11 = sadd.s32 4294967295, %s2005_s10   ;;  %s1712_s12 = sadd.s32 4294967294, %s2005_s10   ;;  %s2005_s10 = sphi %s2077_s10, %s21_s10   ;;  %s2001_s9 = sphi %s2075_s9, %s2482_s9   ;;  %s1997_s30 = sphi %s2073_s30, %s2481_s30   ;;  %s1993_s29 = sphi %s2071_s29, %s2480_s29   ;;  %s1989_s28 = sphi %s2069_s28, %s2479_s28   ;;  %s1985_s27 = sphi %s2067_s27, %s2478_s27  }
   0x5   : > { %s33_s13 = sadd.s32 1, %s2001_s9  ;;  %s232_s14 = sadd.s32 1, %s1993_s29 }
   0x6   : > { %p35_p0 = scmp.ge.s32.totalorder %s33_s13, 2  ;;  %p242_p1 = scmp.ne.s32.totalorder %s1993_s29, %s1989_s28 }
   0x7   : > { %p243_p2 = scmp.eq.s32.totalorder %s1711_s11, 1  ;;  %p248_p3 = scmp.ne.s32.totalorder %s1989_s28, %s1985_s27 }
   0x8   : > { %s2484_s13 = smov (%p35_p0, %s33_s13), 0  ;;  %p249_p5 = scmp.eq.s32.totalorder %s1712_s12, 1 }
   0x9   : > { %p2107_p4 = por %p243_p2, %p242_p1  ;;  %s227_s16 = ssub.s32 %s2001_s9, %s2484_s13 }
   0xa   : > { %p1717_p6 = scmp.ge.s32.totalorder %s2005_s10, 1  ;;  %p230_p7 = scmp.eq.s32.totalorder %s227_s16, 0 }
   0xb   : > { %p2114_p8 = por %p249_p5, %p248_p3  ;;  %p310_p9 = scmp.lt.s32.totalorder %s2005_s10, 3 }
   0xc   : > { %s2120_s18 = scalar_select %p230_p7, %s1993_s29, %s232_s14  }
   0xd   : > { %p311_p10 = pnand %p1717_p6, %p310_p9 }
   0xe   : > { %s2472_s23 = smov (!%p311_p10), 96   ;;  %p358_p11 = scmp.lt.s32.totalorder (!%p311_p10), %s1997_s30, 1 }
   0xf   : > { %314 = sbr.rel (%p311_p10) target bundleno = 1494 (0x5d6), region = 52  ;;  %s2010_s24 = smov (!%p311_p10), 4  }
  0x10   : > { %s2011_s25 = smov (!%p311_p10), 12   ;;  %s2012_s16 = smov (!%p311_p10), 8  }
  0x11   : > { %s2013_s19 = smov (!%p311_p10), 20   ;;  %s2015_s21 = smov (!%p311_p10), 28  }
  0x12   : > { %s2016_s22 = smov (!%p311_p10), 24   ;;  %s2477_s11 = smov (!%p311_p10), 96  }
  0x14   : > { %v385_v0 = vld [vmem:[%s2465_s2 + $0x18] sm:$0xff]  ;;  %v383_v1 = vld [vmem:[%s2465_s2 + $0x8] sm:$0xff]  ;;  %v2007_v2 = vmov 0.0   ;;  %v602_v3 = vld [vmem:[%s2465_s2 + $0x10] sm:$0xff]  ;;  %vm2009_vm0 = vmmov 0   ;;  %s2142_s12 = scalar_select %p358_p11, %s1997_s30, 1 }
  0x15   : > { %1782 = vmatprep.subr.mxu1 %v2007_v2  ;;  %396 = vrot.lane.b32.xlu0 %v385_v0, %s2472_s23  ;;  %v600_v4 = vld [vmem:[%s2465_s2] sm:$0xff]  ;;  %vm402_vm1 = vcmask 261120   ;;  %vm489_vm2 = vcmask 31744   ;;  %vm502_vm3 = vcmask 64544   ;;  %vm517_vm4 = vcmask 97344  }
  0x16   : > { %1783 = vmatpush3.msra.mxu1 %v385_v0  ;;  %392 = vrot.lane.b32.xlu1 %v383_v1, %s2472_s23  ;;  %s2473_s14 = sshll.u32 %s2142_s12, 3  ;;  %v679_v5 = vld [vmem:[%s2468_s5] sm:$0xff]  ;;  %vm532_vm5 = vcmask 130144   ;;  %vm547_vm6 = vcmask 162944   ;;  %vm562_vm7 = vcmask 195744   ;;  %vm577_vm8 = vcmask 228544  }
  0x17   : > { %1784 = vmatprep.subr.mxu1 %v2007_v2  ;;  %1790 = vmatprep.mubr.msk.f32.mxu1 %vm2009_vm0, %v2007_v2  ;;  %s368_s20 = scalar_lea.vmem %s2464_s1, %s2473_s14  ;;  %v2168_v7 = vld [vmem:[%s2470_s7] sm:$0xff]  ;;  %vm592_vm9 = vcmask 261344   ;;  %vm717_vm10 = vcmask 64512   ;;  %vm1086_vm12 = vcmask 130112   ;;  %vm1294_vm13 = vcmask 195712  }
  0x18   : > { %1785 = vmatpush3.msra.mxu1 %v602_v3  ;;  %1771 = vmatprep.subr.mxu0 %v2007_v2  ;;  %v599_v6 = vld [vmem:[%s368_s20] sm:$0xff]  ;;  %s2014_s20 = smov 16   ;;  %vm1502_vm14 = vcmask 261312  }
  0x19   : > { %1786 = vmatprep.subr.mxu1 %v2007_v2  ;;  %394 = vrot.lane.b32.xlu0 %v602_v3, %s2472_s23  ;;  %v2191_v8 = vld [vmem:[%s2467_s4] sm:$0xff] }
  0x1a   : > { %1787 = vmatpush3.msra.mxu1 %v383_v1  ;;  %390 = vrot.lane.b32.xlu1 %v600_v4, %s2472_s23  ;;  %v2200_v9 = vld [vmem:[%s2469_s6] sm:$0xff]  ;;  %s2476_s23 = sshll.u32 %s2142_s12, 3  ;;  %s2017_s12 = smov 124  }
  0x1b   : > { %1788 = vmatprep.subr.mxu1 %v2007_v2  ;;  %1779 = vmatprep.mubr.msk.f32.mxu0 %vm2009_vm0, %v2007_v2  ;;  %s361_s26 = scalar_lea.vmem %s2463_s0, %s2476_s23 }
  0x1c   : > { %1789 = vmatpush3.msra.mxu1 %v600_v4  ;;  %v381_v14 = vld [vmem:[%s361_s26] sm:$0xff] }
  0x1d   : > { %1791 = vmatmul.mubr.msk.f32.vlgmr.msra.gmra.mxu1 %vm402_vm1, %v599_v6  ;;  %690 = vrot.lane.b32.xlu0 %v679_v5, %s2010_s24 }
  0x1e   : > { %884 = vrot.lane.b32.xlu1 %v679_v5, %s2011_s25  ;;  %1793 = vmatprep.subr.mxu1 %v2007_v2 }
  0x1f   : > { %1795 = vmatprep.mubr.msk.f32.mxu1 %vm2009_vm0, %v2007_v2 }
  0x21   : > { %480 = vrot.lane.b32.xlu0 %v2168_v7, %s2010_s24 }
  0x22   : > { %899 = vrot.lane.b32.xlu1 %v679_v5, %s2012_s16 }
  0x25   : > { %508 = vrot.lane.b32.xlu0 %v2168_v7, %s2011_s25 }
  0x26   : > { %523 = vrot.lane.b32.xlu1 %v2168_v7, %s2012_s16 }
  0x29   : > { %538 = vrot.lane.b32.xlu0 %v2168_v7, %s2013_s19 }
  0x2a   : > { %553 = vrot.lane.b32.xlu1 %v2168_v7, %s2014_s20 }
  0x2d   : > { %568 = vrot.lane.b32.xlu0 %v2168_v7, %s2015_s21 }
  0x2e   : > { %583 = vrot.lane.b32.xlu1 %v2168_v7, %s2016_s22 }
  0x31   : > { %1092 = vrot.lane.b32.xlu0 %v679_v5, %s2013_s19 }
  0x32   : > { %1107 = vrot.lane.b32.xlu1 %v679_v5, %s2014_s20 }
  0x35   : > { %1300 = vrot.lane.b32.xlu0 %v679_v5, %s2015_s21 }
  0x36   : > { %1315 = vrot.lane.b32.xlu1 %v679_v5, %s2016_s22 }
  0x39   : > { %702 = vrot.lane.b32.xlu0 %v2191_v8, %s2010_s24 }
  0x3a   : > { %880 = vrot.lane.b32.xlu1 %v2191_v8, %s2012_s16 }
  0x3d   : > { %895 = vrot.lane.b32.xlu0 %v2191_v8, %s2011_s25 }
  0x3e   : > { %492 = vrot.lane.b32.xlu1 %v2200_v9, %s2010_s24 }
  0x41   : > { %504 = vrot.lane.b32.xlu0 %v2200_v9, %s2012_s16 }
  0x42   : > { %519 = vrot.lane.b32.xlu1 %v2200_v9, %s2011_s25 }
  0x46   : > { %534 = vrot.lane.b32.xlu1 %v2200_v9, %s2014_s20 }
  0x4a   : > { %549 = vrot.lane.b32.xlu1 %v2200_v9, %s2013_s19 }
  0x4e   : > { %564 = vrot.lane.b32.xlu1 %v2200_v9, %s2016_s22 }
  0x52   : > { %579 = vrot.lane.b32.xlu1 %v2200_v9, %s2015_s21 }
  0x87   : > { %v397_v10 = vpop.permute.xlu0 %396 }
  0x88   : > { %1772 = vmatpush3.msra.mxu0 %v397_v10  ;;  %v393_v11 = vpop.permute.xlu1 %392 }
  0x89   : > { %1773 = vmatprep.subr.mxu0 %v2007_v2 }
  0x8b   : > { %v395_v12 = vpop.permute.xlu0 %394 }
  0x8c   : > { %1774 = vmatpush3.msra.mxu0 %v395_v12  ;;  %v391_v13 = vpop.permute.xlu1 %390 }
  0x8d   : > { %1775 = vmatprep.subr.mxu0 %v2007_v2 }
  0x8e   : > { %1776 = vmatpush3.msra.mxu0 %v393_v11 }
  0x8f   : > { %1777 = vmatprep.subr.mxu0 %v2007_v2  ;;  %v691_v16 = vpop.permute.xlu0 %690 }
  0x90   : > { %1778 = vmatpush3.msra.mxu0 %v391_v13  ;;  %v885_v15 = vpop.permute.xlu1 %884 }
  0x91   : > { %1780 = vmatmul.mubr.msk.f32.vlgmr.msra.gmra.mxu0 %vm402_vm1, %v381_v14  ;;  %1803 = vmatprep.subr.mxu0 %v2007_v2 }
  0x92   : > { %1805 = vmatprep.mubr.msk.f32.mxu0 %vm2009_vm0, %v2007_v2 }
  0x93   : > { %v481_v27 = vpop.permute.xlu0 %480 }
  0x94   : > { %v900_v18 = vpop.permute.xlu1 %899 }
  0x97   : > { %v509_v29 = vpop.permute.xlu0 %508 }
  0x98   : > { %v524_v24 = vpop.permute.xlu1 %523 }
  0x9b   : > { %v539_v31 = vpop.permute.xlu0 %538 }
  0x9c   : > { %v554_v25 = vpop.permute.xlu1 %553 }
  0x9f   : > { %v569_v33 = vpop.permute.xlu0 %568 }
  0xa0   : > { %v2238_v26 = vpop.permute.xlu1 %583 }
  0xa3   : > { %v1093_v35 = vpop.permute.xlu0 %1092 }
  0xa4   : > { %v1108_v28 = vpop.permute.xlu1 %1107 }
  0xa7   : > { %v1301_v37 = vpop.permute.xlu0 %1300 }
  0xa8   : > { %v1316_v30 = vpop.permute.xlu1 %1315 }
  0xab   : > { %v703_v39 = vpop.permute.xlu0 %702 }
  0xac   : > { %v881_v32 = vpop.permute.xlu1 %880 }
  0xaf   : > { %v896_v41 = vpop.permute.xlu0 %895 }
  0xb0   : > { %v2240_v34 = vpop.permute.xlu1 %492 }
  0xb3   : > { %v2250_v43 = vpop.permute.xlu0 %504 }
  0xb4   : > { %v2242_v36 = vpop.permute.xlu1 %519 }
  0xb8   : > { %v2244_v38 = vpop.permute.xlu1 %534 }
  0xbc   : > { %v2246_v40 = vpop.permute.xlu1 %549 }
  0xc0   : > { %v2248_v42 = vpop.permute.xlu1 %564 }
  0xc4   : > { %v2252_v44 = vpop.permute.xlu1 %579 }
  0xdd   : > { %v2228_v17 = vpop.f32.mrf.mxu1 }
  0xde   : > { %v706_v19 = vmul.f32 %v679_v5, %v2228_v17  ;;  %v693_v20 = vmul.f32 %v691_v16, %v2228_v17  ;;  %v902_v22 = vmul.f32 %v900_v18, %v2228_v17  ;;  %v887_v23 = vmul.f32 %v885_v15, %v2228_v17 }
  0xdf   : > { %v1792_v21 = vpop.f32.mrf.mxu1  ;;  %v705_v45 = vmul.f32 %v703_v39, %v2228_v17  ;;  %v688_v47 = vmul.f32 %v2191_v8, %v2228_v17  ;;  %v883_v57 = vmul.f32 %v881_v32, %v2228_v17  ;;  %v898_v60 = vmul.f32 %v896_v41, %v2228_v17 }
  0xe0   : > { %708 = vrot.lane.b32.xlu0 %v706_v19, %s2010_s24  ;;  %695 = vrot.lane.b32.xlu1 %v693_v20, %s2017_s12  ;;  %v1110_v0 = vmul.f32 %v1108_v28, %v2228_v17  ;;  %v1318_v4 = vmul.f32 %v1316_v30, %v2228_v17  ;;  %v1095_v10 = vmul.f32 %v1093_v35, %v2228_v17 }
  0xe1   : > { %v1303_v11 = vmul.f32 %v1301_v37, %v2228_v17 }
  0xe4   : > { %889 = vrot.lane.b32.xlu0 %v887_v23, %s2017_s12  ;;  %904 = vrot.lane.b32.xlu1 %v902_v22, %s2010_s24 }
 0x151   : > { %v2255_v46 = vpop.f32.mrf.mxu0 }
 0x152   : > { %v709_v48 = vpop.permute.xlu0 %708  ;;  %v696_v49 = vpop.permute.xlu1 %695  ;;  %v496_v50 = vmul.f32 %v2168_v7, %v2255_v46  ;;  %v483_v51 = vmul.f32 %v481_v27, %v2255_v46  ;;  %v511_v55 = vmul.f32 %v509_v29, %v2255_v46  ;;  %v526_v59 = vmul.f32 %v524_v24, %v2255_v46 }
 0x153   : > { %v711_v52 = vadd.f32 %v709_v48, %v705_v45  ;;  %v698_v53 = vsub.f32 %v688_v47, %v696_v49  ;;  %v1781_v54 = vpop.f32.mrf.mxu0  ;;  %v541_v1 = vmul.f32 %v539_v31, %v2255_v46  ;;  %v556_v3 = vmul.f32 %v554_v25, %v2255_v46 }
 0x154   : > { %498 = vrot.lane.b32.xlu0 %v496_v50, %s2010_s24  ;;  %485 = vrot.lane.b32.xlu1 %v483_v51, %s2017_s12  ;;  %v571_v5 = vmul.f32 %v569_v33, %v2255_v46  ;;  %v586_v6 = vmul.f32 %v2238_v26, %v2255_v46  ;;  %v495_v12 = vmul.f32 %v2240_v34, %v2255_v46 }
 0x155   : > { %700 = vst.msk [vmem:[#allocation4] sm:$0xff] %vm489_vm2, %v698_v53  ;;  %v478_v13 = vmul.f32 %v2200_v9, %v2255_v46  ;;  %v507_v19 = vmul.f32 %v2250_v43, %v2255_v46  ;;  %v522_v21 = vmul.f32 %v2242_v36, %v2255_v46  ;;  %v537_v23 = vmul.f32 %v2244_v38, %v2255_v46 }
 0x156   : > { %713 = vst.msk [vmem:[#allocation4] sm:$0xff] %vm502_vm3, %v711_v52  ;;  %v890_v56 = vpop.permute.xlu0 %889  ;;  %v905_v58 = vpop.permute.xlu1 %904  ;;  %v552_v27 = vmul.f32 %v2246_v40, %v2255_v46  ;;  %v567_v31 = vmul.f32 %v2248_v42, %v2255_v46  ;;  %v582_v34 = vmul.f32 %v2252_v44, %v2255_v46 }
 0x157   : > { %v892_v61 = vsub.f32 %v883_v57, %v890_v56  ;;  %v907_v63 = vadd.f32 %v905_v58, %v898_v60 }
 0x158   : > { %513 = vrot.lane.b32.xlu0 %v511_v55, %s2017_s12  ;;  %1088 = vrot.lane.b32.xlu1 %v2191_v8, %s2014_s20 }
 0x15c   : > { %528 = vrot.lane.b32.xlu0 %v526_v59, %s2010_s24  ;;  %1103 = vrot.lane.b32.xlu1 %v2191_v8, %s2013_s19  ;;  %s2018_s19 = smov 120  }
 0x15d   : > { %v2276_v62 = vld [vmem:[#allocation4] sm:$0xff] }
 0x15e   : > { %894 = vst.msk [vmem:[#allocation4] sm:$0xff] %vm517_vm4, %v892_v61  ;;  %v680_v61 = vlaneseq }
 0x15f   : > { %909 = vst.msk [vmem:[#allocation4] sm:$0xff] %vm532_vm5, %v907_v63 }
 0x160   : > { %543 = vrot.lane.b32.xlu0 %v541_v1, %s2017_s12  ;;  %1112 = vrot.lane.b32.xlu1 %v1110_v0, %s2010_s24  ;;  %v686_v63 = vand.u32 127, %v680_v61 }
 0x164   : > { %558 = vrot.lane.b32.xlu0 %v556_v3, %s2010_s24  ;;  %1311 = vrot.lane.b32.xlu1 %v2191_v8, %s2015_s21  ;;  %s2020_s21 = smov 104  }
 0x166   : > { %v910_v7 = vld [vmem:[#allocation4] sm:$0xff] }
 0x168   : > { %573 = vrot.lane.b32.xlu0 %v571_v5, %s2017_s12  ;;  %1320 = vrot.lane.b32.xlu1 %v1318_v4, %s2010_s24 }
 0x16c   : > { %588 = vrot.lane.b32.xlu0 %v586_v6, %s2010_s24  ;;  %914 = vrot.lane.b32.xlu1 %v910_v7, %s2018_s19  ;;  %s2019_s24 = smov 112  }
 0x170   : > { %1097 = vrot.lane.b32.xlu0 %v1095_v10, %s2017_s12 }
 0x174   : > { %1296 = vrot.lane.b32.xlu0 %v2191_v8, %s2016_s22 }
 0x178   : > { %1305 = vrot.lane.b32.xlu0 %v1303_v11, %s2017_s12 }
 0x1c6   : > { %v499_v14 = vpop.permute.xlu0 %498  ;;  %v486_v15 = vpop.permute.xlu1 %485 }
 0x1c7   : > { %v501_v16 = vadd.f32 %v499_v14, %v495_v12  ;;  %v488_v18 = vsub.f32 %v478_v13, %v486_v15 }
 0x1c9   : > { %490 = vst.msk [vmem:[#allocation2] sm:$0xff] %vm489_vm2, %v488_v18 }
 0x1ca   : > { %503 = vst.msk [vmem:[#allocation2] sm:$0xff] %vm502_vm3, %v501_v16  ;;  %v514_v8 = vpop.permute.xlu0 %513  ;;  %v1089_v24 = vpop.permute.xlu1 %1088 }
 0x1cb   : > { %v516_v20 = vsub.f32 %v507_v19, %v514_v8  ;;  %v1091_v38 = vmul.f32 %v1089_v24, %v2228_v17 }
 0x1cd   : > { %518 = vst.msk [vmem:[#allocation2] sm:$0xff] %vm517_vm4, %v516_v20 }
 0x1ce   : > { %v529_v22 = vpop.permute.xlu0 %528  ;;  %v1104_v30 = vpop.permute.xlu1 %1103 }
 0x1cf   : > { %v531_v9 = vadd.f32 %v529_v22, %v522_v21  ;;  %v1106_v39 = vmul.f32 %v1104_v30, %v2228_v17 }
 0x1d1   : > { %533 = vst.msk [vmem:[#allocation2] sm:$0xff] %vm532_vm5, %v531_v9 }
 0x1d2   : > { %v544_v25 = vpop.permute.xlu0 %543  ;;  %v1113_v35 = vpop.permute.xlu1 %1112 }
 0x1d3   : > { %v546_v26 = vsub.f32 %v537_v23, %v544_v25  ;;  %v1115_v42 = vadd.f32 %v1113_v35, %v1106_v39 }
 0x1d5   : > { %548 = vst.msk [vmem:[#allocation2] sm:$0xff] %vm547_vm6, %v546_v26 }
 0x1d6   : > { %v559_v28 = vpop.permute.xlu0 %558  ;;  %v1312_v43 = vpop.permute.xlu1 %1311 }
 0x1d7   : > { %v561_v29 = vadd.f32 %v559_v28, %v552_v27  ;;  %v1314_v50 = vmul.f32 %v1312_v43, %v2228_v17 }
 0x1d9   : > { %563 = vst.msk [vmem:[#allocation2] sm:$0xff] %vm562_vm7, %v561_v29 }
 0x1da   : > { %v574_v32 = vpop.permute.xlu0 %573  ;;  %v1321_v48 = vpop.permute.xlu1 %1320 }
 0x1db   : > { %v576_v33 = vsub.f32 %v567_v31, %v574_v32  ;;  %v1323_v52 = vadd.f32 %v1321_v48, %v1314_v50 }
 0x1dd   : > { %578 = vst.msk [vmem:[#allocation2] sm:$0xff] %vm577_vm8, %v576_v33 }
 0x1de   : > { %v589_v36 = vpop.permute.xlu0 %588  ;;  %v915_v55 = vpop.permute.xlu1 %914 }
 0x1df   : > { %v591_v37 = vadd.f32 %v589_v36, %v582_v34 }
 0x1e1   : > { %593 = vst.msk [vmem:[#allocation2] sm:$0xff] %vm592_vm9, %v591_v37 }
 0x1e2   : > { %v1098_v40 = vpop.permute.xlu0 %1097 }
 0x1e3   : > { %v1100_v41 = vsub.f32 %v1091_v38, %v1098_v40 }
 0x1e5   : > { %1102 = vst.msk [vmem:[#allocation4] sm:$0xff] %vm547_vm6, %v1100_v41 }
 0x1e6   : > { %1117 = vst.msk [vmem:[#allocation4] sm:$0xff] %vm562_vm7, %v1115_v42  ;;  %v1297_v45 = vpop.permute.xlu0 %1296 }
 0x1e7   : > { %v1299_v47 = vmul.f32 %v1297_v45, %v2228_v17 }
 0x1e8   : > { %v911_v44 = vld [vmem:[#allocation2] sm:$0xff] }
 0x1e9   : > { %917 = vrot.lane.b32.xlu0 %v911_v44, %s2018_s19  ;;  %1794 = vmatpush3.xpose.msk.msra.mxu1 %vm717_vm10, %v911_v44 }
 0x1ea   : > { %v1306_v49 = vpop.permute.xlu0 %1305  ;;  %1798 = vmatprep.subr.mxu1 %v2007_v2 }
 0x1eb   : > { %v1308_v51 = vsub.f32 %v1299_v47, %v1306_v49 }
 0x1ec   : > { %1796 = vmatmul.mubr.msk.f32.vlgmr.msra.gmra.mxu1 %vm717_vm10, %v2276_v62  ;;  %v681_v62 = vshrl.u32 %v680_v61, 7 }
 0x1ed   : > { %1125 = vrot.lane.b32.xlu0 %v911_v44, %s2019_s24  ;;  %v1118_v53 = vld [vmem:[#allocation4] sm:$0xff]  ;;  %1800 = vmatprep.mubr.msk.f32.mxu1 %vm2009_vm0, %v2007_v2 }
 0x1ee   : > { %1122 = vrot.lane.b32.xlu1 %v1118_v53, %s2019_s24  ;;  %1310 = vst.msk [vmem:[#allocation4] sm:$0xff] %vm577_vm8, %v1308_v51  ;;  %vm687_vm11 = vcmp.gt.s32.totalorder %v686_v63, %v681_v62  ;;  %v1508_v53 = vld [vmem:[%s2466_s3 + $0x18] sm:$0xff] }
 0x1ef   : > { %1325 = vst.msk [vmem:[#allocation4] sm:$0xff] %vm592_vm9, %v1323_v52 }
 0x1f1   : > { %1333 = vrot.lane.b32.xlu0 %v911_v44, %s2020_s21 }
 0x1f5   : > { %595 = vrot.lane.b32.xlu0 %v2255_v46, %s2477_s11  ;;  %s1737_s11 = sshll.u32 %s1997_s30, 7  ;;  %s2021_s30 = smov [#allocation6]  }
 0x1f6   : > { %v1326_v17 = vld [vmem:[#allocation4] sm:$0xff]  ;;  %s2416_s26 = scalar_lea.hbm %s2471_s8, %s1737_s11 }
 0x1f7   : > { %1330 = vrot.lane.b32.xlu1 %v1326_v17, %s2020_s21  ;;  %v1507_v17 = vld [vmem:[%s2466_s3 + $0x10] sm:$0xff] }
 0x25b   : > { %v918_v54 = vpop.permute.xlu0 %917 }
 0x25c   : > { %1804 = vmatpush3.xpose.msk.msra.mxu0 %vm717_vm10, %v918_v54 }
 0x25d   : > { %1813 = vmatprep.subr.mxu0 %v2007_v2 }
 0x25f   : > { %1806 = vmatmul.mubr.msk.f32.vlgmr.msra.gmra.mxu0 %vm717_vm10, %v915_v55  ;;  %v1126_v56 = vpop.permute.xlu0 %1125  ;;  %v1506_v55 = vld [vmem:[%s2466_s3 + $0x8] sm:$0xff] }
 0x260   : > { %1814 = vmatpush3.xpose.msk.msra.mxu0 %vm717_vm10, %v1126_v56  ;;  %1815 = vmatprep.mubr.msk.f32.mxu0 %vm2009_vm0, %v2007_v2  ;;  %v1123_v46 = vpop.permute.xlu1 %1122 }
 0x261   : > { %1823 = vmatprep.subr.mxu0 %v2007_v2 }
 0x263   : > { %1816 = vmatmul.mubr.msk.f32.vlgmr.msra.gmra.mxu0 %vm717_vm10, %v1123_v46  ;;  %v1334_v57 = vpop.permute.xlu0 %1333 }
 0x264   : > { %1824 = vmatpush3.xpose.msk.msra.mxu0 %vm717_vm10, %v1334_v57  ;;  %1825 = vmatprep.mubr.msk.f32.mxu0 %vm2009_vm0, %v2007_v2 }
 0x265   : > { %1833 = vmatprep.subr.mxu0 %v2007_v2 }
 0x267   : > { %v596_v58 = vpop.permute.xlu0 %595 }
 0x268   : > { %598 = vst.msk [vmem:[#allocation3] sm:$0xff] %vm402_vm1, %v596_v58  ;;  %v1505_v58 = vld [vmem:[%s2466_s3] sm:$0xff] }
 0x269   : > { %v1331_v59 = vpop.permute.xlu1 %1330 }
 0x26a   : > { %1826 = vmatmul.mubr.msk.f32.vlgmr.msra.gmra.mxu0 %vm717_vm10, %v1331_v59 }
 0x26b   : > { %1841 = vmatprep.mubr.msk.f32.mxu0 %vm2009_vm0, %v2007_v2  ;;  %1834 = vmatpush3.msra.mxu0 %v1508_v53 }
 0x26c   : > { %1835 = vmatprep.subr.mxu0 %v2007_v2 }
 0x26d   : > { %1836 = vmatpush3.msra.mxu0 %v1507_v17 }
 0x26e   : > { %1837 = vmatprep.subr.mxu0 %v2007_v2 }
 0x26f   : > { %v716_v60 = vld [vmem:[#allocation3] sm:$0xff]  ;;  %1838 = vmatpush3.msra.mxu0 %v1506_v55 }
 0x270   : > { %1799 = vmatpush3.msra.mxu1 %v716_v60  ;;  %1839 = vmatprep.subr.mxu0 %v2007_v2 }
 0x271   : > { %1808 = vmatprep.subr.mxu1 %v2007_v2  ;;  %1840 = vmatpush3.msra.mxu0 %v1505_v58 }
 0x2ac   : > { %v790_v0 = vpop.f32.mrf.mxu1 }
 0x2ad   : > { %v794_v1 = vsel %vm687_vm11, %v790_v0, -inf }
 0x2ae   : > { %v1797_v3 = vpop.f32.mrf.mxu1  ;;  %v795_v4 = vsel %vm717_vm10, %v794_v1, -inf }
 0x2af   : > { %796 = vmax.xlane.f32.xlu1 %v795_v4 }
 0x2c0   : > { %1212 = vrot.lane.b32.xlu1 %v716_v60, %s2019_s24  ;;  %s1933_s24 = sshll.u32 %s2021_s30, 4  ;;  %s1934_s24 = int_to_ptr.vmem [resolvable:$false] %s1933_s24 }
 0x31f   : > { %v989_v5 = vpop.f32.mrf.mxu0 }
 0x320   : > { %v993_v6 = vsel %vm687_vm11, %v989_v5, -inf }
 0x321   : > { %v1807_v7 = vpop.f32.mrf.mxu0  ;;  %v994_v10 = vsel %vm717_vm10, %v993_v6, -inf }
 0x322   : > { %995 = vmax.xlane.f32.xlu0 %v994_v10 }
 0x323   : > { %v1197_v11 = vpop.f32.mrf.mxu0 }
 0x324   : > { %v1201_v12 = vsel %vm687_vm11, %v1197_v11, -inf }
 0x325   : > { %v1817_v13 = vpop.f32.mrf.mxu0  ;;  %v1202_v14 = vsel %vm717_vm10, %v1201_v12, -inf }
 0x326   : > { %1203 = vmax.xlane.f32.xlu0 %v1202_v14 }
 0x32a   : > { %v1405_v15 = vpop.f32.mrf.mxu0 }
 0x32b   : > { %v1409_v16 = vsel %vm687_vm11, %v1405_v15, -inf }
 0x32c   : > { %v1827_v18 = vpop.f32.mrf.mxu0  ;;  %v1410_v19 = vsel %vm717_vm10, %v1409_v16, -inf }
 0x32d   : > { %1411 = vmax.xlane.f32.xlu1 %v1410_v19 }
 0x338   : > { %v797_v8 = vpop.xlane.xlu1 %796 }
 0x339   : > { %v798_v20 = vsub.f32 %v794_v1, %v797_v8 }
 0x33b   : > { %v799_v21 = vmul.f32 1.442695, %v798_v20 }
 0x33c   : > { %1004 = vrot.lane.b32.xlu0 %v716_v60, %s2018_s19  ;;  %v1213_v27 = vpop.permute.xlu1 %1212 }
 0x33d   : > { %1913 = vpow2.f32 %v799_v21 }
 0x33e   : > { %1420 = vrot.lane.b32.xlu1 %v716_v60, %s2020_s21  ;;  %s1935_s21 = scalar_lea.vmem %s1934_s24, 256 }
 0x34a   : > { %v1914_v22 = vpop.eup %1913 }
 0x34b   : > { %1801 = vmatmul.mubr.msk.f32.vlgmr.msra.gmra.mxu1 %vm717_vm10, %v1914_v22  ;;  %v801_v40 = vsel %vm717_vm10, %v1914_v22, 0.0 }
 0x34c   : > { %1810 = vmatprep.mubr.msk.f32.mxu1 %vm2009_vm0, %v2007_v2 }
 0x3ab   : > { %v996_v9 = vpop.xlane.xlu0 %995 }
 0x3ac   : > { %v997_v23 = vsub.f32 %v993_v6, %v996_v9 }
 0x3ae   : > { %v998_v24 = vmul.f32 1.442695, %v997_v23 }
 0x3af   : > { %v1204_v25 = vpop.xlane.xlu0 %1203 }
 0x3b0   : > { %1915 = vpow2.f32 %v998_v24  ;;  %v1205_v26 = vsub.f32 %v1201_v12, %v1204_v25 }
 0x3b2   : > { %v1206_v28 = vmul.f32 1.442695, %v1205_v26 }
 0x3b3   : > { %v1005_v29 = vpop.permute.xlu0 %1004 }
 0x3b4   : > { %1917 = vpow2.f32 %v1206_v28  ;;  %1809 = vmatpush3.msra.mxu1 %v1005_v29 }
 0x3b5   : > { %1818 = vmatprep.subr.mxu1 %v2007_v2 }
 0x3b6   : > { %v1412_v30 = vpop.xlane.xlu1 %1411 }
 0x3b7   : > { %v1413_v31 = vsub.f32 %v1409_v16, %v1412_v30 }
 0x3b9   : > { %v1414_v32 = vmul.f32 1.442695, %v1413_v31 }
 0x3ba   : > { %v1421_v36 = vpop.permute.xlu1 %1420 }
 0x3bb   : > { %1919 = vpow2.f32 %v1414_v32 }
 0x3bd   : > { %v1916_v33 = vpop.eup %1915 }
 0x3be   : > { %1811 = vmatmul.mubr.msk.f32.vlgmr.msra.gmra.mxu1 %vm717_vm10, %v1916_v33  ;;  %v1000_v34 = vsel %vm717_vm10, %v1916_v33, 0.0 }
 0x3bf   : > { %1819 = vmatpush3.msra.mxu1 %v1213_v27  ;;  %1001 = vadd.xlane.f32.xlu0 %v1000_v34 }
 0x3c0   : > { %1820 = vmatprep.mubr.msk.f32.mxu1 %vm2009_vm0, %v2007_v2  ;;  %1828 = vmatprep.subr.mxu1 %v2007_v2 }
 0x3c1   : > { %v1918_v35 = vpop.eup %1917 }
 0x3c2   : > { %1821 = vmatmul.mubr.msk.f32.vlgmr.msra.gmra.mxu1 %vm717_vm10, %v1918_v35  ;;  %v1208_v37 = vsel %vm717_vm10, %v1918_v35, 0.0 }
 0x3c3   : > { %1829 = vmatpush3.msra.mxu1 %v1421_v36  ;;  %1209 = vadd.xlane.f32.xlu1 %v1208_v37 }
 0x3c4   : > { %1830 = vmatprep.mubr.msk.f32.mxu1 %vm2009_vm0, %v2007_v2 }
 0x3c8   : > { %v1920_v38 = vpop.eup %1919 }
 0x3c9   : > { %1831 = vmatmul.mubr.msk.f32.vlgmr.msra.gmra.mxu1 %vm717_vm10, %v1920_v38  ;;  %v1416_v39 = vsel %vm717_vm10, %v1920_v38, 0.0 }
 0x3ca   : > { %1417 = vadd.xlane.f32.xlu0 %v1416_v39 }
 0x3ce   : > { %802 = vadd.xlane.f32.xlu0 %v801_v40 }
 0x40b   : > { %v873_v41 = vpop.f32.mrf.mxu1 }
 0x40d   : > { %v1802_v42 = vpop.f32.mrf.mxu1 }
 0x448   : > { %v1002_v43 = vpop.xlane.xlu0 %1001 }
 0x44c   : > { %v1210_v49 = vpop.xlane.xlu1 %1209 }
 0x453   : > { %v1418_v45 = vpop.xlane.xlu0 %1417 }
 0x457   : > { %v803_v44 = vpop.xlane.xlu0 %802 }
 0x458   : > { %1921 = vrcp.f32 %v803_v44 }
 0x459   : > { %1923 = vrcp.f32 %v1002_v43 }
 0x45a   : > { %1925 = vrcp.f32 %v1210_v49 }
 0x45b   : > { %1927 = vrcp.f32 %v1418_v45 }
 0x465   : > { %v1922_v47 = vpop.eup %1921 }
 0x466   : > { %v878_v48 = vmul.f32 %v1922_v47, %v873_v41  ;;  %v1924_v50 = vpop.eup %1923 }
 0x467   : > { %v1926_v56 = vpop.eup %1925 }
 0x468   : > { %879 = vst.msk [vmem:[#allocation5] sm:$0xff] %vm717_vm10, %v878_v48  ;;  %v1928_v60 = vpop.eup %1927 }
 0x47e   : > { %v1076_v51 = vpop.f32.mrf.mxu1 }
 0x47f   : > { %v1081_v52 = vmul.f32 %v1924_v50, %v1076_v51 }
 0x480   : > { %v1812_v54 = vpop.f32.mrf.mxu1 }
 0x481   : > { %1083 = vrot.lane.b32.xlu1 %v1081_v52, %s2012_s16  ;;  %s355_s16 = sand.u32 1, %s1989_s28  }
 0x482   : > { %v1284_v46 = vpop.f32.mrf.mxu1  ;;  %s1584_s12 = scalar_lea.sflag [#allocation7], %s355_s16 }
 0x483   : > { %v1289_v57 = vmul.f32 %v1926_v56, %v1284_v46 }
 0x484   : > { %v1822_v59 = vpop.f32.mrf.mxu1 }
 0x485   : > { %1291 = vrot.lane.b32.xlu0 %v1289_v57, %s2014_s20  ;;  %s1718_s20 = sshll.u32 %s355_s16, 3 }
 0x486   : > { %s357_s23 = scalar_lea.vmem [#allocation6], %s1718_s20 }
 0x487   : > { %s1598_s14 = sshll.u32 %s357_s23, 4  ;;  %s2418_s14 = int_to_ptr.vmem [resolvable:$true] %s1598_s14 }
 0x488   : > { %s1929_s19 = scalar_lea.vmem %s2418_s14, 128  ;;  %p1936_p1 = scmp.lt.s32.totalorder %s2418_s14, %s1934_s24 }
 0x489   : > { %v1492_v61 = vpop.f32.mrf.mxu1  ;;  %p1930_p12 = scmp.ne.s32.totalorder %s2418_s14, %s1929_s19  ;;  %p1937_p2 = scmp.lt.s32.totalorder %s1935_s21, %s1929_s19 }
 0x48a   : > { %v1497_v62 = vmul.f32 %v1928_v60, %v1492_v61 }
 0x48b   : > { %v1832_v63 = vpop.f32.mrf.mxu1  ;;  %p1931_p13 = pnand %p1930_p12, %p2107_p4  ;;  %p1938_p3 = por %p1937_p2, %p1936_p1 }
 0x48c   : > { %1499 = vrot.lane.b32.xlu1 %v1497_v62, %s2016_s22 }
 0x48d   : > { %p1932_p0 = pneg %p1931_p13 }
 0x48f   : > { %p1939_p5 = pnand %p1938_p3, %p1932_p0 }
 0x4f3   : > { %v1084_v0 = vpop.permute.xlu1 %1083 }
 0x4f4   : > { %1087 = vst.msk [vmem:[#allocation5] sm:$0xff] %vm1086_vm12, %v1084_v0 }
 0x4f7   : > { %v1292_v1 = vpop.permute.xlu0 %1291 }
 0x4f8   : > { %1295 = vst.msk [vmem:[#allocation5] sm:$0xff] %vm1294_vm13, %v1292_v1 }
 0x4fe   : > { %v1500_v3 = vpop.permute.xlu1 %1499 }
 0x4ff   : > { %1503 = vst.msk [vmem:[#allocation5] sm:$0xff] %vm1502_vm14, %v1500_v3 }
 0x506   : > { %v1504_v2 = vld [vmem:[#allocation5] sm:$0xff] }
 0x507   : > { %1842 = vmatmul.mubr.msk.f32.vlgmr.msra.gmra.mxu0 %vm402_vm1, %v1504_v2 }
 0x5c7   : > { %v1578_v4 = vpop.f32.mrf.mxu0 }
 0x5c8   : > { %1582 = vst.msk [vmem:[%s357_s23] sm:$0xff] %vm402_vm1, %v1578_v4 }
 0x5c9   : > { %v1843_v5 = vpop.f32.mrf.mxu0 }
 0x5ca   : > { %1942 = shalt.err (!%p1939_p5)
}
 0x5cb   : > { %s1943_s20 = scalar_lea.hbm %s2416_s26, 128  ;;  %s1947_s23 = scalar_lea.hbm %s2471_s8, 256 }
 0x5cc   : > { %p1944_p6 = scmp.ne.s32.totalorder %s2416_s26, %s1943_s20  ;;  %p1948_p10 = scmp.lt.s32.totalorder %s2416_s26, %s2471_s8 }
 0x5cd   : > { %p1949_p11 = scmp.lt.s32.totalorder %s1947_s23, %s1943_s20 }
 0x5ce   : > { %p1945_p7 = pnand %p1944_p6, %p2107_p4 }
 0x5cf   : > { %p1950_p12 = por %p1949_p11, %p1948_p10 }
 0x5d0   : > { %p1946_p9 = pneg %p1945_p7 }
 0x5d2   : > { %p1951_p13 = pnand %p1950_p12, %p1946_p9 }
 0x5d4   : > { %1954 = shalt.err (!%p1951_p13)
}
 0x5d5   : > { %1844 = dma.vmem_to_hbm [thread:$0]  (%p2107_p4), %s2418_s14, 128, %s2416_s26, %s1584_s12  }
 0x5d6 PF: > { %p1850_p0 = scmp.ge.s32.totalorder %s2005_s10, 2  ;;  %s1610_s19 = sand.u32 1, %s1985_s27  }
 0x5d7   : > { %s1611_s30 = scalar_lea.sflag [#allocation7], %s1610_s19 }
 0x5d8   : > { %p1847_p1 = pnand %p1850_p0, %p2114_p8 }
 0x5da   : > { %p1848_p2 = pneg %p1847_p1 }
 0x5dc   : > { %1980 = dma.done.wait (%p1848_p2), %s1611_s30, 128  }
 0x5dd   : > { %1982 = vsyncadd (%p1848_p2), %s1611_s30, 4294967168  ;;  %s21_s10 = sadd.s32 1, %s2005_s10   ;;  %s2478_s27 = smov %s1989_s28 }
 0x5de   : > { %p18_p3 = scmp.ge.s32.totalorder %s21_s10, 4   ;;  %s2479_s28 = smov %s1993_s29 }
 0x5df   : > { %s2480_s29 = smov %s2120_s18  ;;  %s2481_s30 = smov %s2001_s9 }
 0x5e0   : > { %s2482_s9 = smov %s2484_s13  ;;  %20 = sbr.rel (!%p18_p3) target bundleno = 4 (0x4), region = 100 }
 0x5e5   :  { %1616 = vsyncpa [#allocation7], 1 }
 0x5e6   :  { %1618 = vsyncpa [#allocation7 + $0x1], 1 }

</bundles_post_ra>
